<compile_context>
chip_gen: v5e
topology: v5e:2x2
jax: 0.10.0
libtpu: 0.0.40
codegen_flags: <defaults>
</compile_context>

<pallas_src>
import jax
import jax.numpy as jnp
from jax.experimental import pallas as pl
from jax.experimental.pallas import tpu as pltpu


def _vmem_spec():
    # Full-array blocks resident in VMEM (all operands here are a few KB).
    return pl.BlockSpec(memory_space=pltpu.MemorySpace.VMEM)


def make_fused_forward_kernel(num_layers):
    """Whole forward in one kernel; layers are Python-unrolled (num_layers is small)."""

    def kernel(*refs):
        (a_ss_ref, a_as_ref, a_us_ref,
         x_sub_ref, x_agr_ref, x_urb_ref) = refs[:6]
        layer_refs = refs[6:6 + 2 * num_layers]            # (w_cat, bias) per layer
        wf_ref, bf_ref, out_ref = refs[6 + 2 * num_layers:]

        a_ss = a_ss_ref[...]                                # bf16, reused every layer

        # 'hru_agr' / 'hru_urb' features are reset to the originals after every layer,
        # so their SAGE neighbor aggregations are layer-invariant: compute once, hoist.
        agg_as = jnp.dot(a_as_ref[...], x_agr_ref[...],
                         preferred_element_type=jnp.float32)
        agg_us = jnp.dot(a_us_ref[...], x_urb_ref[...],
                         preferred_element_type=jnp.float32)
        hru_cat = jnp.concatenate([agg_as, agg_us], axis=1).astype(jnp.bfloat16)

        x = x_sub_ref[...].astype(jnp.bfloat16)             # MXU operand dtype
        for l in range(num_layers):
            w_ref = layer_refs[2 * l]
            b_ref = layer_refs[2 * l + 1]
            # Neighbor aggregation over ('sub','to','sub') edges.
            agg_ss = jnp.dot(a_ss, x,
                             preferred_element_type=jnp.float32).astype(jnp.bfloat16)
            # Single fused matmul over K = d_sub + in_agr + in_urb + d_sub:
            #   [agg_ss | agg_as | agg_us | x_sub] @ [Wl_ss ; Wl_as ; Wl_us ; W_r]
            # (W_r and the biases are pre-summed in the wrapper.)
            h_cat = jnp.concatenate([agg_ss, hru_cat, x], axis=1)
            h = jnp.dot(h_cat, w_ref[...],
                        preferred_element_type=jnp.float32) + b_ref[...]
            # ReLU in f32; BatchNorm is Identity (batch_norm=False); Dropout = eval identity.
            x = jnp.maximum(h, 0.0).astype(jnp.bfloat16)

        # Final Linear + softmax(dim=1), all VMEM-resident.
        logits = jnp.dot(x, wf_ref[...],
                         preferred_element_type=jnp.float32) + bf_ref[...]
        m = jnp.max(logits, axis=1, keepdims=True)
        e = jnp.exp(logits - m)
        denom = jnp.sum(e, axis=1, keepdims=True)
        out_ref[...] = e * pl.reciprocal(denom, approx=True)

    return kernel


def _fold_layer_params(p):
    # HeteroConv aggr='sum': the three lin_r weights act on the same x_sub and are summed,
    # so pre-sum them; then concatenate all lin weights along K for one fused MXU matmul.
    w_r = p["wr_ss"] + p["wr_as"] + p["wr_us"]
    w_cat = jnp.concatenate([p["wl_ss"], p["wl_as"], p["wl_us"], w_r], axis=0)
    return w_cat.astype(jnp.bfloat16), p["bias"].astype(jnp.float32)


def hetero_graph_forward(x_sub, x_agr, x_urb, a_ss, a_as, a_us, layer_params, wf, bf):
    num_layers = len(layer_params)
    folded = [_fold_layer_params(p) for p in layer_params]

    args = [a_ss.astype(jnp.bfloat16), a_as.astype(jnp.bfloat16), a_us.astype(jnp.bfloat16),
            x_sub.astype(jnp.float32), x_agr.astype(jnp.bfloat16), x_urb.astype(jnp.bfloat16)]
    for w_cat, bias in folded:
        args += [w_cat, bias]
    args += [wf.astype(jnp.bfloat16), bf.astype(jnp.float32)]

    n_sub = x_sub.shape[0]
    out_dims = wf.shape[1]
    return pl.pallas_call(
        make_fused_forward_kernel(num_layers),
        out_shape=jax.ShapeDtypeStruct((n_sub, out_dims), jnp.float32),
        in_specs=[_vmem_spec() for _ in args],
        out_specs=_vmem_spec(),
    )(*args)


if __name__ == "__main__":
    key = jax.random.PRNGKey(0)
    keys = iter(jax.random.split(key, 40))

    # Small shapes consistent with the module.
    num_sub, num_agr, num_urb = 16, 16, 8
    in_sub, in_agr, in_urb = 8, 8, 8
    hidden_dims, out_dims, num_layers = 32, 4, 3

    # Node features (x_dict).
    x_sub = jax.random.normal(next(keys), (num_sub, in_sub), jnp.float32)
    x_agr = jax.random.normal(next(keys), (num_agr, in_agr), jnp.float32)
    x_urb = jax.random.normal(next(keys), (num_urb, in_urb), jnp.float32)

    # edge_index_dict -> dense adjacency A[dst, src] (glue, plain JAX).
    def rand_edges(k, n_src, n_dst, n_edges):
        k1, k2 = jax.random.split(k)
        src = jax.random.randint(k1, (n_edges,), 0, n_src)
        dst = jax.random.randint(k2, (n_edges,), 0, n_dst)
        return src, dst

    def dense_adj(src, dst, n_src, n_dst):
        return jnp.zeros((n_dst, n_src), jnp.float32).at[dst, src].add(1.0)

    s, d = rand_edges(next(keys), num_sub, num_sub, 48)
    a_ss = dense_adj(s, d, num_sub, num_sub)          # ('sub','to','sub')
    s, d = rand_edges(next(keys), num_agr, num_sub, 32)
    a_as = dense_adj(s, d, num_agr, num_sub)          # ('hru_agr','to','sub')
    s, d = rand_edges(next(keys), num_urb, num_sub, 24)
    a_us = dense_adj(s, d, num_urb, num_sub)          # ('hru_urb','to','sub')

    # Deterministic synthetic parameters (shapes from __init__). Linear weights stored
    # as (in, out) = PyTorch weight.T; SAGEConv lin_l has bias, lin_r does not.
    def w(k, fan_in, fan_out):
        return jax.random.normal(k, (fan_in, fan_out), jnp.float32) * 0.1

    layer_params = []
    for layer_idx in range(num_layers):
        d_sub = in_sub if layer_idx == 0 else hidden_dims
        b_ss = jax.random.normal(next(keys), (1, hidden_dims), jnp.float32) * 0.1
        b_as = jax.random.normal(next(keys), (1, hidden_dims), jnp.float32) * 0.1
        b_us = jax.random.normal(next(keys), (1, hidden_dims), jnp.float32) * 0.1
        layer_params.append(dict(
            wl_ss=w(next(keys), d_sub, hidden_dims),
            wr_ss=w(next(keys), d_sub, hidden_dims),
            wl_as=w(next(keys), in_agr, hidden_dims),
            wr_as=w(next(keys), d_sub, hidden_dims),
            wl_us=w(next(keys), in_urb, hidden_dims),
            wr_us=w(next(keys), d_sub, hidden_dims),
            bias=b_ss + b_as + b_us,   # biases sum linearly under HeteroConv 'sum'
        ))
    wf = w(next(keys), hidden_dims, out_dims)
    bf = jax.random.normal(next(keys), (1, out_dims), jnp.float32) * 0.1

    out = hetero_graph_forward(x_sub, x_agr, x_urb, a_ss, a_as, a_us,
                               layer_params, wf, bf)
    jax.block_until_ready(out)

    assert out.shape == (num_sub, out_dims)
    assert bool(jnp.all(jnp.isfinite(out)))
    # Softmax rows must sum to ~1 (loose tolerance: bf16 operands + approx reciprocal).
    row_sums = jnp.sum(out, axis=1)
    assert bool(jnp.all(jnp.abs(row_sums - 1.0) < 1e-2))
    print("KERNEL_OK")
</pallas_src>

<mosaic_0001>
module attributes {stable_mosaic.version = 11 : i64} {
  func.func @kernel(%arg0: memref<16x16xbf16, #tpu.memory_space<vmem>>, %arg1: memref<16x16xbf16, #tpu.memory_space<vmem>>, %arg2: memref<16x8xbf16, #tpu.memory_space<vmem>>, %arg3: memref<16x8xf32, #tpu.memory_space<vmem>>, %arg4: memref<16x8xbf16, #tpu.memory_space<vmem>>, %arg5: memref<8x8xbf16, #tpu.memory_space<vmem>>, %arg6: memref<32x32xbf16, #tpu.memory_space<vmem>>, %arg7: memref<1x32xf32, #tpu.memory_space<vmem>>, %arg8: memref<80x32xbf16, #tpu.memory_space<vmem>>, %arg9: memref<1x32xf32, #tpu.memory_space<vmem>>, %arg10: memref<80x32xbf16, #tpu.memory_space<vmem>>, %arg11: memref<1x32xf32, #tpu.memory_space<vmem>>, %arg12: memref<32x4xbf16, #tpu.memory_space<vmem>>, %arg13: memref<1x4xf32, #tpu.memory_space<vmem>>, %arg14: memref<16x4xf32, #tpu.memory_space<vmem>>) attributes {dimension_semantics = [], scalar_prefetch = 0 : i64, scratch_operands = 0 : i64, tpu.core_type = #tpu.core_type<tc>} {
    %c0 = arith.constant 0 : index
    %c0_0 = arith.constant 0 : index
    %0 = vector.load %arg0[%c0, %c0_0] : memref<16x16xbf16, #tpu.memory_space<vmem>>, vector<16x16xbf16>
    %c0_1 = arith.constant 0 : index
    %c0_2 = arith.constant 0 : index
    %1 = vector.load %arg1[%c0_1, %c0_2] : memref<16x16xbf16, #tpu.memory_space<vmem>>, vector<16x16xbf16>
    %c0_3 = arith.constant 0 : index
    %c0_4 = arith.constant 0 : index
    %2 = vector.load %arg4[%c0_3, %c0_4] : memref<16x8xbf16, #tpu.memory_space<vmem>>, vector<16x8xbf16>
    %cst = arith.constant dense<0.000000e+00> : vector<16x8xf32>
    %3 = tpu.matmul %1, %2, %cst {dimension_numbers = #tpu.dot_dimension_numbers<[1], [0], [0], [1], [0, 0, 1, 1], [], []>} : vector<16x16xbf16>, vector<16x8xbf16>, vector<16x8xf32> -> vector<16x8xf32>
    %c0_5 = arith.constant 0 : index
    %c0_6 = arith.constant 0 : index
    %4 = vector.load %arg2[%c0_5, %c0_6] : memref<16x8xbf16, #tpu.memory_space<vmem>>, vector<16x8xbf16>
    %c0_7 = arith.constant 0 : index
    %c0_8 = arith.constant 0 : index
    %5 = vector.load %arg5[%c0_7, %c0_8] : memref<8x8xbf16, #tpu.memory_space<vmem>>, vector<8x8xbf16>
    %cst_9 = arith.constant dense<0.000000e+00> : vector<16x8xf32>
    %6 = tpu.matmul %4, %5, %cst_9 {dimension_numbers = #tpu.dot_dimension_numbers<[1], [0], [0], [1], [0, 0, 1, 1], [], []>} : vector<16x8xbf16>, vector<8x8xbf16>, vector<16x8xf32> -> vector<16x8xf32>
    %7 = tpu.concatenate %3, %6 in 1 : vector<16x8xf32>, vector<16x8xf32> -> vector<16x16xf32>
    %8 = arith.truncf %7 : vector<16x16xf32> to vector<16x16xbf16>
    %c0_10 = arith.constant 0 : index
    %c0_11 = arith.constant 0 : index
    %9 = vector.load %arg3[%c0_10, %c0_11] : memref<16x8xf32, #tpu.memory_space<vmem>>, vector<16x8xf32>
    %10 = arith.truncf %9 : vector<16x8xf32> to vector<16x8xbf16>
    %cst_12 = arith.constant dense<0.000000e+00> : vector<16x8xf32>
    %11 = tpu.matmul %0, %10, %cst_12 {dimension_numbers = #tpu.dot_dimension_numbers<[1], [0], [0], [1], [0, 0, 1, 1], [], []>} : vector<16x16xbf16>, vector<16x8xbf16>, vector<16x8xf32> -> vector<16x8xf32>
    %12 = arith.truncf %11 : vector<16x8xf32> to vector<16x8xbf16>
    %13 = tpu.concatenate %12, %8, %10 in 1 : vector<16x8xbf16>, vector<16x16xbf16>, vector<16x8xbf16> -> vector<16x32xbf16>
    %c0_13 = arith.constant 0 : index
    %c0_14 = arith.constant 0 : index
    %14 = vector.load %arg6[%c0_13, %c0_14] : memref<32x32xbf16, #tpu.memory_space<vmem>>, vector<32x32xbf16>
    %cst_15 = arith.constant dense<0.000000e+00> : vector<16x32xf32>
    %15 = tpu.matmul %13, %14, %cst_15 {dimension_numbers = #tpu.dot_dimension_numbers<[1], [0], [0], [1], [0, 0, 1, 1], [], []>} : vector<16x32xbf16>, vector<32x32xbf16>, vector<16x32xf32> -> vector<16x32xf32>
    %c0_16 = arith.constant 0 : index
    %c0_17 = arith.constant 0 : index
    %16 = vector.load %arg7[%c0_16, %c0_17] : memref<1x32xf32, #tpu.memory_space<vmem>>, vector<1x32xf32>
    %17 = vector.broadcast %16 : vector<1x32xf32> to vector<16x32xf32>
    %18 = arith.addf %15, %17 : vector<16x32xf32>
    %cst_18 = arith.constant 0.000000e+00 : f32
    %19 = vector.broadcast %cst_18 : f32 to vector<16x32xf32>
    %20 = arith.maximumf %18, %19 : vector<16x32xf32>
    %21 = arith.truncf %20 : vector<16x32xf32> to vector<16x32xbf16>
    %cst_19 = arith.constant dense<0.000000e+00> : vector<16x32xf32>
    %22 = tpu.matmul %0, %21, %cst_19 {dimension_numbers = #tpu.dot_dimension_numbers<[1], [0], [0], [1], [0, 0, 1, 1], [], []>} : vector<16x16xbf16>, vector<16x32xbf16>, vector<16x32xf32> -> vector<16x32xf32>
    %23 = arith.truncf %22 : vector<16x32xf32> to vector<16x32xbf16>
    %24 = tpu.concatenate %23, %8, %21 in 1 : vector<16x32xbf16>, vector<16x16xbf16>, vector<16x32xbf16> -> vector<16x80xbf16>
    %c0_20 = arith.constant 0 : index
    %c0_21 = arith.constant 0 : index
    %25 = vector.load %arg8[%c0_20, %c0_21] : memref<80x32xbf16, #tpu.memory_space<vmem>>, vector<80x32xbf16>
    %cst_22 = arith.constant dense<0.000000e+00> : vector<16x32xf32>
    %26 = tpu.matmul %24, %25, %cst_22 {dimension_numbers = #tpu.dot_dimension_numbers<[1], [0], [0], [1], [0, 0, 1, 1], [], []>} : vector<16x80xbf16>, vector<80x32xbf16>, vector<16x32xf32> -> vector<16x32xf32>
    %c0_23 = arith.constant 0 : index
    %c0_24 = arith.constant 0 : index
    %27 = vector.load %arg9[%c0_23, %c0_24] : memref<1x32xf32, #tpu.memory_space<vmem>>, vector<1x32xf32>
    %28 = vector.broadcast %27 : vector<1x32xf32> to vector<16x32xf32>
    %29 = arith.addf %26, %28 : vector<16x32xf32>
    %cst_25 = arith.constant 0.000000e+00 : f32
    %30 = vector.broadcast %cst_25 : f32 to vector<16x32xf32>
    %31 = arith.maximumf %29, %30 : vector<16x32xf32>
    %32 = arith.truncf %31 : vector<16x32xf32> to vector<16x32xbf16>
    %cst_26 = arith.constant dense<0.000000e+00> : vector<16x32xf32>
    %33 = tpu.matmul %0, %32, %cst_26 {dimension_numbers = #tpu.dot_dimension_numbers<[1], [0], [0], [1], [0, 0, 1, 1], [], []>} : vector<16x16xbf16>, vector<16x32xbf16>, vector<16x32xf32> -> vector<16x32xf32>
    %34 = arith.truncf %33 : vector<16x32xf32> to vector<16x32xbf16>
    %35 = tpu.concatenate %34, %8, %32 in 1 : vector<16x32xbf16>, vector<16x16xbf16>, vector<16x32xbf16> -> vector<16x80xbf16>
    %c0_27 = arith.constant 0 : index
    %c0_28 = arith.constant 0 : index
    %36 = vector.load %arg10[%c0_27, %c0_28] : memref<80x32xbf16, #tpu.memory_space<vmem>>, vector<80x32xbf16>
    %cst_29 = arith.constant dense<0.000000e+00> : vector<16x32xf32>
    %37 = tpu.matmul %35, %36, %cst_29 {dimension_numbers = #tpu.dot_dimension_numbers<[1], [0], [0], [1], [0, 0, 1, 1], [], []>} : vector<16x80xbf16>, vector<80x32xbf16>, vector<16x32xf32> -> vector<16x32xf32>
    %c0_30 = arith.constant 0 : index
    %c0_31 = arith.constant 0 : index
    %38 = vector.load %arg11[%c0_30, %c0_31] : memref<1x32xf32, #tpu.memory_space<vmem>>, vector<1x32xf32>
    %39 = vector.broadcast %38 : vector<1x32xf32> to vector<16x32xf32>
    %40 = arith.addf %37, %39 : vector<16x32xf32>
    %cst_32 = arith.constant 0.000000e+00 : f32
    %41 = vector.broadcast %cst_32 : f32 to vector<16x32xf32>
    %42 = arith.maximumf %40, %41 : vector<16x32xf32>
    %43 = arith.truncf %42 : vector<16x32xf32> to vector<16x32xbf16>
    %c0_33 = arith.constant 0 : index
    %c0_34 = arith.constant 0 : index
    %44 = vector.load %arg12[%c0_33, %c0_34] : memref<32x4xbf16, #tpu.memory_space<vmem>>, vector<32x4xbf16>
    %cst_35 = arith.constant dense<0.000000e+00> : vector<16x4xf32>
    %45 = tpu.matmul %43, %44, %cst_35 {dimension_numbers = #tpu.dot_dimension_numbers<[1], [0], [0], [1], [0, 0, 1, 1], [], []>} : vector<16x32xbf16>, vector<32x4xbf16>, vector<16x4xf32> -> vector<16x4xf32>
    %c0_36 = arith.constant 0 : index
    %c0_37 = arith.constant 0 : index
    %46 = vector.load %arg13[%c0_36, %c0_37] : memref<1x4xf32, #tpu.memory_space<vmem>>, vector<1x4xf32>
    %47 = vector.broadcast %46 : vector<1x4xf32> to vector<16x4xf32>
    %48 = arith.addf %45, %47 : vector<16x4xf32>
    %cst_38 = arith.constant dense<0xFF800000> : vector<16xf32>
    %49 = vector.multi_reduction <maximumf>, %48, %cst_38 [1] : vector<16x4xf32> to vector<16xf32>
    %50 = vector.shape_cast %49 : vector<16xf32> to vector<16x1xf32>
    %51 = vector.broadcast %50 : vector<16x1xf32> to vector<16x4xf32>
    %52 = arith.subf %48, %51 : vector<16x4xf32>
    %53 = math.exp %52 : vector<16x4xf32>
    %cst_39 = arith.constant dense<0.000000e+00> : vector<16xf32>
    %54 = vector.multi_reduction <add>, %53, %cst_39 [1] : vector<16x4xf32> to vector<16xf32>
    %55 = vector.shape_cast %54 : vector<16xf32> to vector<16x1xf32>
    %56 = tpu.reciprocal %55 {approx = true} : vector<16x1xf32> -> vector<16x1xf32>
    %57 = vector.broadcast %56 : vector<16x1xf32> to vector<16x4xf32>
    %58 = arith.mulf %53, %57 : vector<16x4xf32>
    %c0_40 = arith.constant 0 : index
    %c0_41 = arith.constant 0 : index
    %59 = vector.load %arg14[%c0_40, %c0_41] : memref<16x4xf32, #tpu.memory_space<vmem>>, vector<16x4xf32>
    tpu.vector_store %arg14[%c0_40, %c0_41], %58 {strides = array<i32>} : memref<16x4xf32, #tpu.memory_space<vmem>>, vector<16x4xf32>,
    return
  }
}

</mosaic_0001>

<bundles_post_ra>
// kernel: tpu_custom_call.1
= control target key start
LH: loop header
LB: loop body
LE: loop exit
PB: predicated region body
PF: predicated region fallthrough
CT: control target
= control target key end

     0   :  { %vm95_vm0 = vcmask 1043456   ;;  %vm91_vm1 = vcmask 64512   ;;  %vm65_vm2 = vcmask 130048   ;;  %s604_s23 = smov 24   ;;  %vm176_vm3 = vcmask 195584   ;;  %s607_s29 = smov 48   ;;  %s793_s5 = inlined_call_operand.vmem [shape: bf16[8,8], index: 5, kind: input, shape index: {}]   ;;  %s794_s2 = inlined_call_operand.vmem [shape: bf16[16,8], index: 2, kind: input, shape index: {}]   ;;  %s795_s4 = inlined_call_operand.vmem [shape: bf16[16,8], index: 4, kind: input, shape index: {}]   ;;  %s796_s1 = inlined_call_operand.vmem [shape: bf16[16,16], index: 1, kind: input, shape index: {}]   ;;  %s797_s3 = inlined_call_operand.vmem [shape: f32[16,8], index: 3, kind: input, shape index: {}]   ;;  %s798_s0 = inlined_call_operand.vmem [shape: bf16[16,16], index: 0, kind: input, shape index: {}]   ;;  %s799_s6 = inlined_call_operand.vmem [shape: bf16[32,32], index: 6, kind: input, shape index: {}]   ;;  %s800_s7 = inlined_call_operand.vmem [shape: f32[1,32], index: 7, kind: input, shape index: {}]   ;;  %s801_s9 = inlined_call_operand.vmem [shape: f32[1,32], index: 9, kind: input, shape index: {}]   ;;  %s802_s8 = inlined_call_operand.vmem [shape: bf16[80,32], index: 8, kind: input, shape index: {}]   ;;  %s803_s11 = inlined_call_operand.vmem [shape: f32[1,32], index: 11, kind: input, shape index: {}]   ;;  %s804_s10 = inlined_call_operand.vmem [shape: bf16[80,32], index: 10, kind: input, shape index: {}]   ;;  %s805_s13 = inlined_call_operand.vmem [shape: f32[1,4], index: 13, kind: input, shape index: {}]   ;;  %s806_s12 = inlined_call_operand.vmem [shape: bf16[32,4], index: 12, kind: input, shape index: {}]   ;;  %s807_s14 = inlined_call_operand.vmem [shape: f32[16,4], index: 14, kind: output, shape index: {}]  }
   0x1   :  { %v85_v0 = vld [vmem:[%s793_s5] sm:$0xf]  ;;  %v126_v6 = vld [vmem:[%s797_s3 + $0x8] sm:$0xff]  ;;  %vm199_vm4 = vcmask 261120   ;;  %v574_v54 = vld [vmem:[%s802_s8 + $0x18] sm:$0xff]  ;;  %vm254_vm5 = vcmask 392192  }
   0x2   :  { %v567_v1 = vld [vmem:[%s795_s4] sm:$0xff]  ;;  %v97_v2 = vsel %vm95_vm0, %v85_v0, 0  ;;  %v128_v8 = vpack.c.bf16 %v126_v6, %v126_v6  ;;  %v570_v16 = vld [vmem:[%s799_s6 + $0x8] sm:$0xff]  ;;  %v573_v55 = vld [vmem:[%s802_s8 + $0x10] sm:$0xff]  ;;  %vm301_vm6 = vcmask 654336   ;;  %vm455_vm7 = vcmask 31744  }
   0x3   :  { %v568_v3 = vld [vmem:[%s794_s2] sm:$0xff]  ;;  %106 = vmatpush.bf16.msra.mxu1 %v97_v2  ;;  %76 = vmatpush.bf16.msra.mxu0 %v567_v1  ;;  %v572_v56 = vld [vmem:[%s802_s8 + $0x8] sm:$0xff] }
   0x4   :  { %v566_v4 = vld [vmem:[%s796_s1] sm:$0xff]  ;;  %v137_v10 = vunpack.c.l.b16 %v128_v8  ;;  %208 = vmatpush.bf16.msra.mxu3 %v570_v16 }
   0x5   :  { %v125_v5 = vld [vmem:[%s797_s3] sm:$0xff]  ;;  %s605_s3 = smov 8  }
   0x6   :  { %497 = vmatmul.msk.bf16.vlgmr.msra.gmra.mxu1 %vm91_vm1, %v568_v3  ;;  %492 = vmatmul.msk.bf16.vlgmr.msra.gmra.mxu0 %vm65_vm2, %v566_v4  ;;  %v127_v7 = vpack.c.bf16 %v125_v5, %v125_v5  ;;  %v706_v12 = vld [vmem:[%s798_s0] sm:$0xff]  ;;  %s606_s0 = smov 32  }
   0x7   :  { %v569_v17 = vld [vmem:[%s799_s6] sm:$0xff] }
   0x8   :  { %v136_v9 = vunpack.c.l.b16 %v127_v7  ;;  %209 = vmatpush.bf16.msra.mxu3 %v569_v17  ;;  %v592_v41 = vld [vmem:[%s800_s7] ss:$0 sm:$0xff] }
   0x9   :  { %v575_v53 = vld [vmem:[%s802_s8 + $0x20] sm:$0xff] }
   0xa   :  { %v138_v11 = vpack.c.b16 %v137_v10, %v136_v9  ;;  %307 = vmatpush.bf16.msrb.mxu1 %v575_v53  ;;  %v571_v57 = vld [vmem:[%s802_s8] sm:$0xff] }
   0xb   :  { %v593_v5 = vld [vmem:[%s801_s9] ss:$0 sm:$0xff] }
   0xc   :  { %150 = vmatpush.bf16.msra.mxu2 %v138_v11  ;;  %171 = vrot.lane.b32.xlu1 %v138_v11, %s604_s23 }
   0xe   :  { %308 = vmatpush.bf16.msrb.mxu1 %v574_v54 }
   0xf   :  { %502 = vmatmul.msk.bf16.vlgmr.msra.gmra.mxu2 %vm65_vm2, %v706_v12 }
  0x12   :  { %309 = vmatpush.bf16.msrb.mxu1 %v573_v55 }
  0x16   :  { %310 = vmatpush.bf16.msrb.mxu1 %v572_v56 }
  0x1a   :  { %311 = vmatpush.bf16.msrb.mxu1 %v571_v57 }
  0x7e   :  { %v172_v38 = vpop.permute.xlu1 %171 }
  0x83   :  { %v108_v13 = vpop.f32.mrf.mxu1  ;;  %v78_v18 = vpop.f32.mrf.mxu0 }
  0x8b   :  { %v110_v14 = vpop.f32.mrf.mxu1  ;;  %v80_v22 = vpop.f32.mrf.mxu0 }
  0x8c   :  { %v587_v15 = vpack.i.bf16 %v110_v14, %v108_v13 }
  0x8e   :  { %588 = vrot.lane.b32.xlu0 %v587_v15, %s605_s3 }
  0x92   :  { %v152_v30 = vpop.f32.mrf.mxu2 }
  0x93   :  { %v157_v32 = vpack.c.bf16 %v152_v30, %v152_v30 }
  0x95   :  { %v161_v34 = vunpack.c.l.b16 %v157_v32  ;;  %v582_v32 = vld [vmem:[%s806_s12 + $0x8] sm:$0xff] }
  0x9a   :  { %v154_v31 = vpop.f32.mrf.mxu2 }
  0x9b   :  { %v158_v33 = vpack.c.bf16 %v154_v31, %v154_v31 }
  0x9d   :  { %v162_v35 = vunpack.c.l.b16 %v158_v33  ;;  %v581_v33 = vld [vmem:[%s806_s12] sm:$0xff] }
  0x9f   :  { %v163_v36 = vpack.c.b16 %v162_v35, %v161_v34  ;;  %v594_v35 = vld [vmem:[%s803_s11] ss:$0 sm:$0xff] }
 0x100   :  { %v589_v19 = vpop.permute.xlu0 %588 }
 0x101   :  { %v591_v20 = vunpack.i.h.bf16 %v589_v19  ;;  %v590_v21 = vunpack.i.l.bf16 %v589_v19  ;;  %v579_v19 = vld [vmem:[%s804_s10 + $0x18] sm:$0xff] }
 0x103   :  { %v121_v23 = vsel %vm91_vm1, %v78_v18, %v590_v21  ;;  %v122_v24 = vsel %vm91_vm1, %v80_v22, %v591_v20  ;;  %v580_v18 = vld [vmem:[%s804_s10 + $0x20] sm:$0xff]  ;;  %v578_v20 = vld [vmem:[%s804_s10 + $0x10] sm:$0xff]  ;;  %v577_v21 = vld [vmem:[%s804_s10 + $0x8] sm:$0xff] }
 0x104   :  { %v123_v25 = vpack.c.bf16 %v121_v23, %v121_v23  ;;  %v124_v26 = vpack.c.bf16 %v122_v24, %v122_v24  ;;  %404 = vmatpush.bf16.msrb.mxu3 %v580_v18 }
 0x106   :  { %v166_v27 = vunpack.c.l.b16 %v123_v25  ;;  %v167_v28 = vunpack.c.l.b16 %v124_v26 }
 0x108   :  { %v168_v29 = vpack.c.b16 %v167_v28, %v166_v27  ;;  %405 = vmatpush.bf16.msrb.mxu3 %v579_v19 }
 0x10a   :  { %247 = vrot.lane.b32.xlu1 %v168_v29, %s606_s0  ;;  %169 = vrot.lane.b32.xlu0 %v168_v29, %s605_s3 }
 0x10c   :  { %406 = vmatpush.bf16.msrb.mxu3 %v578_v20 }
 0x110   :  { %407 = vmatpush.bf16.msrb.mxu3 %v577_v21 }
 0x17c   :  { %v170_v37 = vpop.permute.xlu0 %169  ;;  %v248_v1 = vpop.permute.xlu1 %247 }
 0x17d   :  { %v175_v39 = vsel %vm91_vm1, %v163_v36, %v170_v37 }
 0x17e   :  { %v178_v40 = vsel %vm176_vm3, %v175_v39, %v172_v38 }
 0x17f   :  { %511 = vmatmul.msk.bf16.vlgmr.msra.gmra.mxu3 %vm199_vm4, %v178_v40 }
 0x202   :  { %v211_v42 = vpop.f32.mrf.mxu3 }
 0x203   :  { %v212_v43 = vadd.f32 %v592_v41, %v211_v42  ;;  %v595_v42 = vld [vmem:[%s805_s13] ss:$0 sm:$0xff] }
 0x205   :  { %v216_v44 = vmax.f32 %v212_v43, 0.0 }
 0x207   :  { %v218_v47 = vpack.c.bf16 %v216_v44, %v216_v44 }
 0x209   :  { %v222_v50 = vunpack.c.l.b16 %v218_v47 }
 0x20a   :  { %v213_v45 = vpop.f32.mrf.mxu3 }
 0x20b   :  { %v214_v46 = vadd.f32 %v592_v41, %v213_v45 }
 0x20d   :  { %v217_v48 = vmax.f32 %v214_v46, 0.0 }
 0x20f   :  { %v219_v49 = vpack.c.bf16 %v217_v48, %v217_v48 }
 0x211   :  { %v223_v51 = vunpack.c.l.b16 %v219_v49 }
 0x213   :  { %v224_v52 = vpack.c.b16 %v223_v51, %v222_v50 }
 0x215   :  { %249 = vrot.lane.b32.xlu2 %v224_v52, %s607_s29  ;;  %233 = vmatpush.bf16.msrb.mxu0 %v224_v52 }
 0x218   :  { %512 = vmatmul.msk.bf16.vlgmr.msrb.gmra.mxu0 %vm65_vm2, %v706_v12 }
 0x219   :  { %447 = vmatpush.bf16.msra.mxu0 %v582_v32 }
 0x21d   :  { %448 = vmatpush.bf16.msra.mxu0 %v581_v33 }
 0x26f   :  { %v250_v2 = vpop.permute.xlu2 %249 }
 0x295   :  { %v235_v58 = vpop.f32.mrf.mxu0 }
 0x296   :  { %v240_v59 = vpack.c.bf16 %v235_v58, %v235_v58 }
 0x298   :  { %v244_v62 = vunpack.c.l.b16 %v240_v59 }
 0x29d   :  { %v237_v60 = vpop.f32.mrf.mxu0 }
 0x29e   :  { %v241_v61 = vpack.c.bf16 %v237_v60, %v237_v60 }
 0x2a0   :  { %v245_v63 = vunpack.c.l.b16 %v241_v61 }
 0x2a2   :  { %v246_v0 = vpack.c.b16 %v245_v63, %v244_v62 }
 0x2a4   :  { %v253_v3 = vsel %vm199_vm4, %v246_v0, %v248_v1 }
 0x2a5   :  { %v256_v4 = vsel %vm254_vm5, %v253_v3, %v250_v2 }
 0x2a6   :  { %533 = vmatmul.msk.bf16.vlgmr.msrb.gmra.mxu1 %vm301_vm6, %v256_v4 }
 0x323   :  { %v313_v6 = vpop.f32.mrf.mxu1 }
 0x324   :  { %v314_v7 = vadd.f32 %v593_v5, %v313_v6 }
 0x326   :  { %v318_v8 = vmax.f32 %v314_v7, 0.0 }
 0x328   :  { %v320_v11 = vpack.c.bf16 %v318_v8, %v318_v8 }
 0x32a   :  { %v324_v15 = vunpack.c.l.b16 %v320_v11 }
 0x32b   :  { %v315_v9 = vpop.f32.mrf.mxu1 }
 0x32c   :  { %v316_v10 = vadd.f32 %v593_v5, %v315_v9 }
 0x32e   :  { %v319_v13 = vmax.f32 %v316_v10, 0.0 }
 0x330   :  { %v321_v14 = vpack.c.bf16 %v319_v13, %v319_v13 }
 0x332   :  { %v325_v16 = vunpack.c.l.b16 %v321_v14 }
 0x334   :  { %v326_v17 = vpack.c.b16 %v325_v16, %v324_v15 }
 0x336   :  { %349 = vrot.lane.b32.xlu2 %v326_v17, %s607_s29  ;;  %335 = vmatpush.bf16.msrb.mxu2 %v326_v17 }
 0x339   :  { %534 = vmatmul.msk.bf16.vlgmr.msrb.gmra.mxu2 %vm65_vm2, %v706_v12  ;;  %v576_v12 = vld [vmem:[%s804_s10] sm:$0xff] }
 0x33a   :  { %408 = vmatpush.bf16.msrb.mxu3 %v576_v12 }
 0x390   :  { %v350_v29 = vpop.permute.xlu2 %349 }
 0x3bc   :  { %v337_v22 = vpop.f32.mrf.mxu2 }
 0x3bd   :  { %v342_v23 = vpack.c.bf16 %v337_v22, %v337_v22 }
 0x3bf   :  { %v346_v26 = vunpack.c.l.b16 %v342_v23 }
 0x3c4   :  { %v339_v24 = vpop.f32.mrf.mxu2 }
 0x3c5   :  { %v343_v25 = vpack.c.bf16 %v339_v24, %v339_v24 }
 0x3c7   :  { %v347_v27 = vunpack.c.l.b16 %v343_v25 }
 0x3c9   :  { %v348_v28 = vpack.c.b16 %v347_v27, %v346_v26 }
 0x3cb   :  { %v352_v30 = vsel %vm199_vm4, %v348_v28, %v248_v1 }
 0x3cc   :  { %v354_v31 = vsel %vm254_vm5, %v352_v30, %v350_v29 }
 0x3cd   :  { %555 = vmatmul.msk.bf16.vlgmr.msrb.gmra.mxu3 %vm301_vm6, %v354_v31 }
 0x450   :  { %v410_v34 = vpop.f32.mrf.mxu3 }
 0x451   :  { %v411_v36 = vadd.f32 %v594_v35, %v410_v34 }
 0x453   :  { %v415_v39 = vmax.f32 %v411_v36, 0.0 }
 0x458   :  { %v412_v37 = vpop.f32.mrf.mxu3 }
 0x459   :  { %v413_v38 = vadd.f32 %v594_v35, %v412_v37 }
 0x45b   :  { %v416_v40 = vmax.f32 %v413_v38, 0.0 }
 0x45d   :  { %v417_v41 = vpack.c.bf16 %v416_v40, %v415_v39 }
 0x45f   :  { %564 = vmatmul.msk.bf16.vlgmr.msra.gmra.mxu0 %vm199_vm4, %v417_v41 }
 0x4dc   :  { %v450_v43 = vpop.f32.mrf.mxu0 }
 0x4dd   :  { %v451_v44 = vadd.f32 %v595_v42, %v450_v43 }
 0x4df   :  { %v456_v45 = vsel %vm455_vm7, %v451_v44, -inf }
 0x4e0   :  { %457 = vmax.xlane.f32.xlu0 %v456_v45 }
 0x4e4   :  { %v452_v46 = vpop.f32.mrf.mxu0 }
 0x4e5   :  { %v453_v47 = vadd.f32 %v595_v42, %v452_v46 }
 0x4e7   :  { %v459_v48 = vsel %vm455_vm7, %v453_v47, -inf }
 0x4e8   :  { %460 = vmax.xlane.f32.xlu1 %v459_v48 }
 0x553   :  { %v458_v49 = vpop.xlane.xlu0 %457 }
 0x554   :  { %v462_v50 = vsub.f32 %v451_v44, %v458_v49 }
 0x556   :  { %v464_v51 = vmul.f32 1.442695, %v462_v50 }
 0x558   :  { %596 = vpow2.f32 %v464_v51 }
 0x55b   :  { %v461_v52 = vpop.xlane.xlu1 %460 }
 0x55c   :  { %v463_v53 = vsub.f32 %v453_v47, %v461_v52 }
 0x55e   :  { %v597_v54 = vpop.eup %596  ;;  %v466_v55 = vmul.f32 1.442695, %v463_v53 }
 0x55f   :  { %v468_v56 = vsel %vm455_vm7, %v597_v54, 0.0 }
 0x560   :  { %598 = vpow2.f32 %v466_v55  ;;  %469 = vadd.xlane.f32.xlu2 %v468_v56 }
 0x566   :  { %v599_v57 = vpop.eup %598 }
 0x567   :  { %v471_v58 = vsel %vm455_vm7, %v599_v57, 0.0 }
 0x568   :  { %472 = vadd.xlane.f32.xlu2 %v471_v58 }
 0x5d3   :  { %v470_v59 = vpop.xlane.xlu2 %469 }
 0x5d4   :  { %600 = vrcp.f32 %v470_v59 }
 0x5da   :  { %v601_v60 = vpop.eup %600 }
 0x5db   :  { %v476_v61 = vmul.f32 %v601_v60, %v597_v54  ;;  %v473_v62 = vpop.xlane.xlu2 %472 }
 0x5dc   :  { %602 = vrcp.f32 %v473_v62 }
 0x5dd   :  { %478 = vst.msk [vmem:[%s807_s14] sm:$0xff] %vm455_vm7, %v476_v61 }
 0x5e2   :  { %v603_v63 = vpop.eup %602 }
 0x5e3   :  { %v477_v0 = vmul.f32 %v603_v63, %v599_v57 }
 0x5e5   :  { %479 = vst.msk [vmem:[%s807_s14 + $0x8] sm:$0xff] %vm455_vm7, %v477_v0 }

</bundles_post_ra>
